<compile_context>
chip_gen: v5e
topology: v5e:2x2
jax: 0.10.0
libtpu: 0.0.40
codegen_flags: <defaults>
</compile_context>

<pallas_src>
import math

import jax
import jax.numpy as jnp
from jax.experimental import pallas as pl
from jax.experimental.pallas import tpu as pltpu

EPS = 1e-5


def ffn_kernel(x_ref, w_ref, b_ref, attn_ref, g_ref, beta_ref, o_ref, acc_ref):
    k = pl.program_id(1)

    @pl.when(k == 0)
    def _():
        acc_ref[...] = jnp.zeros_like(acc_ref)

    # x: (tm, tk), w: (H, tk)  -> contract over the shared K axis.
    # (Weight is kept in its PyTorch (H, K) layout; no wrapper transpose.)
    acc_ref[...] += jax.lax.dot_general(
        x_ref[...], w_ref[...],
        dimension_numbers=(((1,), (1,)), ((), ())),
        preferred_element_type=jnp.float32)

    @pl.when(k == pl.num_programs(1) - 1)
    def _():
        h = acc_ref.shape[-1]
        inv_h = 1.0 / h

        # Read the small broadcast operands once per tile (f32 math throughout).
        bias = b_ref[...].astype(jnp.float32)      # (1, H)
        gamma = g_ref[...].astype(jnp.float32)     # (1, H)
        beta = beta_ref[...].astype(jnp.float32)   # (1, H)

        z = acc_ref[...] + bias + attn_ref[...].astype(jnp.float32)

        # Single-pass LayerNorm: var = E[z^2] - E[z]^2 (clamped at 0).
        s = jnp.sum(z, axis=-1, keepdims=True)
        sq = jnp.sum(z * z, axis=-1, keepdims=True)
        mean = s * inv_h
        var = jnp.maximum(sq * inv_h - mean * mean, 0.0)
        norm = (z - mean) * jax.lax.rsqrt(var + EPS)

        o_ref[...] = (norm * gamma + beta).astype(o_ref.dtype)


def _largest_tile(total, max_tile, align):
    """Largest `align`-multiple divisor of `total` that is <= max_tile.

    Falls back to the full dimension (a full-extent block is always legal).
    """
    if total <= max_tile:
        return total
    t = (max_tile // align) * align
    while t >= align:
        if total % t == 0:
            return t
        t -= align
    return total


def _nbytes(shape, dtype):
    n = 1
    for d in shape:
        n *= d
    return n * jnp.dtype(dtype).itemsize


def ffn_forward(x, attn, weight, bias, gamma, beta, *, compute_dtype=None):
    """x: (..., inter_size), attn: (..., h_size), weight: (h_size, inter_size).

    compute_dtype: dtype for the matmul operands (e.g. jnp.bfloat16 on v6e/v7x).
    Accumulation and all LayerNorm math stay f32. In production the weight
    should already be stored in `compute_dtype` to avoid an extra HBM pass.
    """
    inter_size = x.shape[-1]
    h_size = attn.shape[-1]
    lead = x.shape[:-1]
    n = math.prod(lead) if lead else 1
    out_dtype = attn.dtype
    cdt = x.dtype if compute_dtype is None else compute_dtype

    x2 = x.reshape(n, inter_size).astype(cdt)
    w = weight.astype(cdt)                       # stays (h_size, inter_size)
    attn2 = attn.reshape(n, h_size)
    b2 = bias.reshape(1, h_size)
    g2 = gamma.reshape(1, h_size)
    be2 = beta.reshape(1, h_size)

    # Row tile (sublane-aligned) and K tile (lane-aligned); conservative caps
    # so the double-buffered working set also fits v7x's 64 MiB VMEM.
    tm = _largest_tile(n, 256, 8)
    tk = _largest_tile(inter_size, 512, 128)
    grid = (n // tm, inter_size // tk)

    # VMEM budget: double-buffered x/w/attn/out tiles + f32 accumulator + params.
    vmem_est = (2 * _nbytes((tm, tk), cdt)
                + 2 * _nbytes((h_size, tk), cdt)
                + 2 * _nbytes((tm, h_size), attn2.dtype)
                + 2 * _nbytes((tm, h_size), out_dtype)
                + _nbytes((tm, h_size), jnp.float32)
                + 6 * _nbytes((1, h_size), jnp.float32))
    vmem_limit = int(min(max(2 * vmem_est, 4 << 20), 64 << 20))

    cost = pl.CostEstimate(
        flops=2 * n * inter_size * h_size,
        transcendentals=n,  # one rsqrt per row
        bytes_accessed=(x2.size * x2.dtype.itemsize
                        + w.size * w.dtype.itemsize
                        + attn2.size * attn2.dtype.itemsize
                        + (b2.size + g2.size + be2.size) * 4
                        + n * h_size * jnp.dtype(out_dtype).itemsize))

    out = pl.pallas_call(
        ffn_kernel,
        out_shape=jax.ShapeDtypeStruct((n, h_size), out_dtype),
        grid_spec=pltpu.PrefetchScalarGridSpec(
            num_scalar_prefetch=0,
            grid=grid,
            in_specs=[
                pl.BlockSpec((tm, tk), lambda i, kk: (i, kk)),          # x
                pl.BlockSpec((h_size, tk), lambda i, kk: (0, kk)),      # W (H,K)
                pl.BlockSpec((1, h_size), lambda i, kk: (0, 0)),        # bias
                pl.BlockSpec((tm, h_size), lambda i, kk: (i, 0)),       # attn
                pl.BlockSpec((1, h_size), lambda i, kk: (0, 0)),        # gamma
                pl.BlockSpec((1, h_size), lambda i, kk: (0, 0)),        # beta
            ],
            out_specs=pl.BlockSpec((tm, h_size), lambda i, kk: (i, 0)),
            scratch_shapes=[pltpu.VMEM((tm, h_size), jnp.float32)],
        ),
        compiler_params=pltpu.CompilerParams(
            dimension_semantics=("parallel", "arbitrary"),
            vmem_limit_bytes=vmem_limit),
        cost_estimate=cost,
    )(x2, w, b2, attn2, g2, be2)
    return out.reshape(*lead, h_size)


def ffn_reference(x, attn, weight, bias, gamma, beta):
    y = jnp.einsum("...k,hk->...h", x, weight) + bias
    z = y + attn
    mean = jnp.mean(z, axis=-1, keepdims=True)
    var = jnp.mean((z - mean) ** 2, axis=-1, keepdims=True)
    return (z - mean) / jnp.sqrt(var + EPS) * gamma + beta


if __name__ == "__main__":
    batch, seq = 2, 8
    h_size, inter_size = 128, 256   # lane-dense H (multiple of 128)

    key = jax.random.PRNGKey(0)
    k_x, k_attn, k_w, k_b = jax.random.split(key, 4)

    x = jax.random.normal(k_x, (batch, seq, inter_size), dtype=jnp.float32)
    attn = jax.random.normal(k_attn, (batch, seq, h_size), dtype=jnp.float32)

    # Deterministic "synthetic checkpoint" parameters (nn.Linear + nn.LayerNorm).
    weight = jax.random.normal(k_w, (h_size, inter_size), dtype=jnp.float32) * 0.05
    bias = jax.random.normal(k_b, (h_size,), dtype=jnp.float32) * 0.05
    gamma = jnp.ones((h_size,), dtype=jnp.float32)
    beta = jnp.zeros((h_size,), dtype=jnp.float32)

    ref = ffn_reference(x, attn, weight, bias, gamma, beta)

    # f32 matmul path (tight check vs reference).
    out = ffn_forward(x, attn, weight, bias, gamma, beta)
    out = jax.block_until_ready(out)
    assert out.shape == (batch, seq, h_size)
    assert jnp.allclose(out, ref, atol=5e-5, rtol=1e-5), "f32 path mismatch"

    # bf16 matmul operands (v6e/v7x MXU path), f32 accumulation + f32 LayerNorm.
    out_bf16 = ffn_forward(x, attn, weight, bias, gamma, beta,
                           compute_dtype=jnp.bfloat16)
    out_bf16 = jax.block_until_ready(out_bf16)
    assert out_bf16.shape == (batch, seq, h_size)
    assert jnp.allclose(out_bf16, ref, atol=1e-1, rtol=1e-1), "bf16 path mismatch"

    print("KERNEL_OK")
</pallas_src>

<mosaic_0001>
module attributes {stable_mosaic.version = 11 : i64} {
  func.func @ffn_kernel(%arg0: i32, %arg1: i32, %arg2: memref<16x256xf32, #tpu.memory_space<vmem>>, %arg3: memref<128x256xf32, #tpu.memory_space<vmem>>, %arg4: memref<1x128xf32, #tpu.memory_space<vmem>>, %arg5: memref<16x128xf32, #tpu.memory_space<vmem>>, %arg6: memref<1x128xf32, #tpu.memory_space<vmem>>, %arg7: memref<1x128xf32, #tpu.memory_space<vmem>>, %arg8: memref<16x128xf32, #tpu.memory_space<vmem>>, %arg9: memref<16x128xf32, #tpu.memory_space<vmem>>) attributes {dimension_semantics = [#tpu.dimension_semantics<parallel>, #tpu.dimension_semantics<arbitrary>], iteration_bounds = array<i64: 1, 1>, scalar_prefetch = 0 : i64, scratch_operands = 1 : i64, tpu.core_type = #tpu.core_type<tc>, window_params = [{transform_indices = @transform_0, window_bounds = array<i64: 16, 256>}, {transform_indices = @transform_1, window_bounds = array<i64: 128, 256>}, {pipeline_mode = #tpu.pipeline_mode<synchronous>, transform_indices = @transform_2, window_bounds = array<i64: 1, 128>}, {transform_indices = @transform_3, window_bounds = array<i64: 16, 128>}, {pipeline_mode = #tpu.pipeline_mode<synchronous>, transform_indices = @transform_4, window_bounds = array<i64: 1, 128>}, {pipeline_mode = #tpu.pipeline_mode<synchronous>, transform_indices = @transform_5, window_bounds = array<i64: 1, 128>}, {transform_indices = @transform_6, window_bounds = array<i64: 16, 128>}]} {
    %c0_i32 = arith.constant 0 : i32
    %0 = arith.cmpi eq, %arg1, %c0_i32 : i32
    %1 = arith.extui %0 : i1 to i32
    %c0_i32_0 = arith.constant 0 : i32
    %2 = arith.cmpi ne, %1, %c0_i32_0 : i32
    scf.if %2 {
      %cst_10 = arith.constant 0.000000e+00 : f32
      %12 = vector.broadcast %cst_10 : f32 to vector<16x128xf32>
      %c0_11 = arith.constant 0 : index
      %c0_12 = arith.constant 0 : index
      %13 = vector.load %arg9[%c0_11, %c0_12] : memref<16x128xf32, #tpu.memory_space<vmem>>, vector<16x128xf32>
      tpu.vector_store %arg9[%c0_11, %c0_12], %12 {strides = array<i32>} : memref<16x128xf32, #tpu.memory_space<vmem>>, vector<16x128xf32>,
    } else {
    }
    %c0 = arith.constant 0 : index
    %c0_1 = arith.constant 0 : index
    %3 = vector.load %arg9[%c0, %c0_1] : memref<16x128xf32, #tpu.memory_space<vmem>>, vector<16x128xf32>
    %c0_2 = arith.constant 0 : index
    %c0_3 = arith.constant 0 : index
    %4 = vector.load %arg2[%c0_2, %c0_3] : memref<16x256xf32, #tpu.memory_space<vmem>>, vector<16x256xf32>
    %c0_4 = arith.constant 0 : index
    %c0_5 = arith.constant 0 : index
    %5 = vector.load %arg3[%c0_4, %c0_5] : memref<128x256xf32, #tpu.memory_space<vmem>>, vector<128x256xf32>
    %cst = arith.constant dense<0.000000e+00> : vector<16x128xf32>
    %6 = tpu.matmul %4, %5, %cst {dimension_numbers = #tpu.dot_dimension_numbers<[1], [1], [0], [0], [0, 0, 1, 0], [], []>} : vector<16x256xf32>, vector<128x256xf32>, vector<16x128xf32> -> vector<16x128xf32>
    %7 = arith.addf %3, %6 : vector<16x128xf32>
    %c0_6 = arith.constant 0 : index
    %c0_7 = arith.constant 0 : index
    %8 = vector.load %arg9[%c0_6, %c0_7] : memref<16x128xf32, #tpu.memory_space<vmem>>, vector<16x128xf32>
    tpu.vector_store %arg9[%c0_6, %c0_7], %7 {strides = array<i32>} : memref<16x128xf32, #tpu.memory_space<vmem>>, vector<16x128xf32>,
    %c0_i32_8 = arith.constant 0 : i32
    %9 = arith.cmpi eq, %arg1, %c0_i32_8 : i32
    %10 = arith.extui %9 : i1 to i32
    %c0_i32_9 = arith.constant 0 : i32
    %11 = arith.cmpi ne, %10, %c0_i32_9 : i32
    scf.if %11 {
      %c0_10 = arith.constant 0 : index
      %c0_11 = arith.constant 0 : index
      %12 = vector.load %arg4[%c0_10, %c0_11] : memref<1x128xf32, #tpu.memory_space<vmem>>, vector<1x128xf32>
      %c0_12 = arith.constant 0 : index
      %c0_13 = arith.constant 0 : index
      %13 = vector.load %arg6[%c0_12, %c0_13] : memref<1x128xf32, #tpu.memory_space<vmem>>, vector<1x128xf32>
      %c0_14 = arith.constant 0 : index
      %c0_15 = arith.constant 0 : index
      %14 = vector.load %arg7[%c0_14, %c0_15] : memref<1x128xf32, #tpu.memory_space<vmem>>, vector<1x128xf32>
      %c0_16 = arith.constant 0 : index
      %c0_17 = arith.constant 0 : index
      %15 = vector.load %arg9[%c0_16, %c0_17] : memref<16x128xf32, #tpu.memory_space<vmem>>, vector<16x128xf32>
      %16 = vector.broadcast %12 : vector<1x128xf32> to vector<16x128xf32>
      %17 = arith.addf %15, %16 : vector<16x128xf32>
      %c0_18 = arith.constant 0 : index
      %c0_19 = arith.constant 0 : index
      %18 = vector.load %arg5[%c0_18, %c0_19] : memref<16x128xf32, #tpu.memory_space<vmem>>, vector<16x128xf32>
      %19 = arith.addf %17, %18 : vector<16x128xf32>
      %cst_20 = arith.constant dense<0.000000e+00> : vector<16xf32>
      %20 = vector.multi_reduction <add>, %19, %cst_20 [1] : vector<16x128xf32> to vector<16xf32>
      %21 = vector.shape_cast %20 : vector<16xf32> to vector<16x1xf32>
      %22 = arith.mulf %19, %19 : vector<16x128xf32>
      %cst_21 = arith.constant dense<0.000000e+00> : vector<16xf32>
      %23 = vector.multi_reduction <add>, %22, %cst_21 [1] : vector<16x128xf32> to vector<16xf32>
      %24 = vector.shape_cast %23 : vector<16xf32> to vector<16x1xf32>
      %cst_22 = arith.constant 7.812500e-03 : f32
      %25 = vector.broadcast %cst_22 : f32 to vector<16x1xf32>
      %26 = arith.mulf %21, %25 : vector<16x1xf32>
      %cst_23 = arith.constant 7.812500e-03 : f32
      %27 = vector.broadcast %cst_23 : f32 to vector<16x1xf32>
      %28 = arith.mulf %24, %27 : vector<16x1xf32>
      %29 = arith.mulf %26, %26 : vector<16x1xf32>
      %30 = arith.subf %28, %29 : vector<16x1xf32>
      %cst_24 = arith.constant 0.000000e+00 : f32
      %31 = vector.broadcast %cst_24 : f32 to vector<16x1xf32>
      %32 = arith.maximumf %30, %31 : vector<16x1xf32>
      %33 = vector.broadcast %26 : vector<16x1xf32> to vector<16x128xf32>
      %34 = arith.subf %19, %33 : vector<16x128xf32>
      %cst_25 = arith.constant 9.99999974E-6 : f32
      %35 = vector.broadcast %cst_25 : f32 to vector<16x1xf32>
      %36 = arith.addf %32, %35 : vector<16x1xf32>
      %37 = math.rsqrt %36 : vector<16x1xf32>
      %38 = vector.broadcast %37 : vector<16x1xf32> to vector<16x128xf32>
      %39 = arith.mulf %34, %38 : vector<16x128xf32>
      %40 = vector.broadcast %13 : vector<1x128xf32> to vector<16x128xf32>
      %41 = arith.mulf %39, %40 : vector<16x128xf32>
      %42 = vector.broadcast %14 : vector<1x128xf32> to vector<16x128xf32>
      %43 = arith.addf %41, %42 : vector<16x128xf32>
      %c0_26 = arith.constant 0 : index
      %c0_27 = arith.constant 0 : index
      %44 = vector.load %arg8[%c0_26, %c0_27] : memref<16x128xf32, #tpu.memory_space<vmem>>, vector<16x128xf32>
      tpu.vector_store %arg8[%c0_26, %c0_27], %43 {strides = array<i32>} : memref<16x128xf32, #tpu.memory_space<vmem>>, vector<16x128xf32>,
    } else {
    }
    return
  }
  func.func @transform_0(%arg0: i32, %arg1: i32) -> (i32, i32) {
    %c0_i32 = arith.constant 0 : i32
    return %arg0, %arg1 : i32, i32
  }
  func.func @transform_1(%arg0: i32, %arg1: i32) -> (i32, i32) {
    %c0_i32 = arith.constant 0 : i32
    %c0_i32_0 = arith.constant 0 : i32
    return %c0_i32, %arg1 : i32, i32
  }
  func.func @transform_2(%arg0: i32, %arg1: i32) -> (i32, i32) {
    %c0_i32 = arith.constant 0 : i32
    %c0_i32_0 = arith.constant 0 : i32
    %c0_i32_1 = arith.constant 0 : i32
    return %c0_i32, %c0_i32_0 : i32, i32
  }
  func.func @transform_3(%arg0: i32, %arg1: i32) -> (i32, i32) {
    %c0_i32 = arith.constant 0 : i32
    %c0_i32_0 = arith.constant 0 : i32
    return %arg0, %c0_i32 : i32, i32
  }
  func.func @transform_4(%arg0: i32, %arg1: i32) -> (i32, i32) {
    %c0_i32 = arith.constant 0 : i32
    %c0_i32_0 = arith.constant 0 : i32
    %c0_i32_1 = arith.constant 0 : i32
    return %c0_i32, %c0_i32_0 : i32, i32
  }
  func.func @transform_5(%arg0: i32, %arg1: i32) -> (i32, i32) {
    %c0_i32 = arith.constant 0 : i32
    %c0_i32_0 = arith.constant 0 : i32
    %c0_i32_1 = arith.constant 0 : i32
    return %c0_i32, %c0_i32_0 : i32, i32
  }
  func.func @transform_6(%arg0: i32, %arg1: i32) -> (i32, i32) {
    %c0_i32 = arith.constant 0 : i32
    %c0_i32_0 = arith.constant 0 : i32
    return %arg0, %c0_i32 : i32, i32
  }
}

</mosaic_0001>

<bundles_post_ra>
// kernel: tpu_custom_call.1
= control target key start
LH: loop header
LB: loop body
LE: loop exit
PB: predicated region body
PF: predicated region fallthrough
CT: control target
= control target key end

     0   :  { %11 = vsyncpa [#allocation4], 0  ;;  %s479_s0 = inlined_call_operand.hbm [shape: f32[16,256], index: 0, kind: input, shape index: {}]   ;;  %s480_s1 = inlined_call_operand.hbm [shape: f32[128,256], index: 1, kind: input, shape index: {}]   ;;  %s481_s2 = inlined_call_operand.vmem [shape: f32[1,128], index: 2, kind: input, shape index: {}]   ;;  %s482_s3 = inlined_call_operand.hbm [shape: f32[16,128], index: 3, kind: input, shape index: {}]   ;;  %s483_s4 = inlined_call_operand.vmem [shape: f32[1,128], index: 4, kind: input, shape index: {}]   ;;  %s484_s5 = inlined_call_operand.vmem [shape: f32[1,128], index: 5, kind: input, shape index: {}]   ;;  %s485_s6 = inlined_call_operand.hbm [shape: f32[16,128], index: 6, kind: output, shape index: {}]  }
   0x1   :  { %12 = vsyncpa [#allocation7], 0 }
   0x2   :  { %13 = vsyncpa [#allocation5], 0  ;;  %s31_s23 = sshll.u32 %s480_s1, 4  ;;  %s409_s24 = smov [#allocation6]   ;;  %s32_s23 = int_to_ptr.hbm [resolvable:$true] %s31_s23 }
   0x3   :  { %s33_s25 = sshll.u32 %s409_s24, 4  ;;  %s18_s28 = sshll.u32 %s479_s0, 4  ;;  %s34_s25 = int_to_ptr.vmem [resolvable:$true] %s33_s25  ;;  %s19_s28 = int_to_ptr.hbm [resolvable:$true] %s18_s28 }
   0x4   :  { %s410_s29 = smov 256   ;;  %s411_s30 = smov 16  }
   0x5   :  { %39 = dma.hbm_to_vmem [thread:$0]  %s32_s23, 4096, %s34_s25, [#allocation7], %s410_s29, %s410_s29, %s411_s30  }
   0x6   :  { %s412_s7 = smov [#allocation3]   ;;  %s46_s11 = sshll.u32 %s482_s3, 4  ;;  %s47_s11 = int_to_ptr.hbm [resolvable:$true] %s46_s11 }
   0x7   :  { %s20_s8 = sshll.u32 %s412_s7, 4  ;;  %s413_s1 = smov [#allocation8]   ;;  %s21_s8 = int_to_ptr.vmem [resolvable:$true] %s20_s8 }
   0x8   :  { %26 = dma.hbm_to_vmem [thread:$0]  %s19_s28, 512, %s21_s8, [#allocation4], %s410_s29, %s410_s29, %s411_s30  }
   0x9   :  { %s48_s12 = sshll.u32 %s413_s1, 4  ;;  %s414_s13 = smov 128   ;;  %s49_s12 = int_to_ptr.vmem [resolvable:$true] %s48_s12 }
   0xa   :  { %s415_s14 = smov 8  }
   0xb   :  { %54 = dma.hbm_to_vmem [thread:$0]  %s47_s11, 256, %s49_s12, [#allocation7], %s414_s13, %s414_s13, %s415_s14  }
   0xc   :  { %403 = dma.done.wait [#allocation4], 512  }
   0xd   :  { %404 = vsyncadd [#allocation4], 4294966784 }
   0xe   :  { %405 = dma.done.wait [#allocation7], 4352  }
   0xf   :  { %406 = vsyncadd [#allocation7], 4294962944  ;;  %v113_v0 = vld [vmem:[#allocation6 + $0xf0] sm:$0xff]  ;;  %v114_v1 = vld [vmem:[#allocation6 + $0xf8] sm:$0xff]  ;;  %s246_s21 = sshll.u32 %s485_s6, 4  ;;  %s247_s21 = int_to_ptr.hbm [resolvable:$true] %s246_s21 }
  0x10   :  { %115 = vmatpush.xpose.msra.mxu0 %v113_v0  ;;  %138 = vmatpush.xpose.msra.mxu1 %v114_v1  ;;  %v111_v2 = vld [vmem:[#allocation6 + $0xe0] sm:$0xff]  ;;  %v112_v3 = vld [vmem:[#allocation6 + $0xe8] sm:$0xff]  ;;  %v109_v4 = vld [vmem:[#allocation6 + $0xd0] sm:$0xff] }
  0x11   :  { %260 = vmatpush.xpose.msra.mxu2 %v113_v0  ;;  %276 = vmatpush.xpose.msra.mxu3 %v114_v1  ;;  %v110_v5 = vld [vmem:[#allocation6 + $0xd8] sm:$0xff]  ;;  %v107_v6 = vld [vmem:[#allocation6 + $0xc0] sm:$0xff]  ;;  %v108_v7 = vld [vmem:[#allocation6 + $0xc8] sm:$0xff] }
  0x12   :  { %v105_v8 = vld [vmem:[#allocation6 + $0xb0] sm:$0xff]  ;;  %v106_v9 = vld [vmem:[#allocation6 + $0xb8] sm:$0xff]  ;;  %v103_v10 = vld [vmem:[#allocation6 + $0xa0] sm:$0xff] }
  0x13   :  { %v104_v11 = vld [vmem:[#allocation6 + $0xa8] sm:$0xff]  ;;  %v101_v12 = vld [vmem:[#allocation6 + $0x90] sm:$0xff]  ;;  %v102_v13 = vld [vmem:[#allocation6 + $0x98] sm:$0xff] }
  0x14   :  { %116 = vmatpush.xpose.msra.mxu0 %v111_v2  ;;  %139 = vmatpush.xpose.msra.mxu1 %v112_v3  ;;  %v99_v14 = vld [vmem:[#allocation6 + $0x80] sm:$0xff]  ;;  %v100_v15 = vld [vmem:[#allocation6 + $0x88] sm:$0xff]  ;;  %v97_v16 = vld [vmem:[#allocation6 + $0x70] sm:$0xff] }
  0x15   :  { %261 = vmatpush.xpose.msra.mxu2 %v111_v2  ;;  %277 = vmatpush.xpose.msra.mxu3 %v112_v3  ;;  %v98_v17 = vld [vmem:[#allocation6 + $0x78] sm:$0xff]  ;;  %v95_v18 = vld [vmem:[#allocation6 + $0x60] sm:$0xff]  ;;  %v96_v19 = vld [vmem:[#allocation6 + $0x68] sm:$0xff] }
  0x16   :  { %v93_v20 = vld [vmem:[#allocation6 + $0x50] sm:$0xff]  ;;  %v94_v21 = vld [vmem:[#allocation6 + $0x58] sm:$0xff]  ;;  %v91_v22 = vld [vmem:[#allocation6 + $0x40] sm:$0xff] }
  0x17   :  { %v92_v23 = vld [vmem:[#allocation6 + $0x48] sm:$0xff]  ;;  %v89_v24 = vld [vmem:[#allocation6 + $0x30] sm:$0xff]  ;;  %v90_v25 = vld [vmem:[#allocation6 + $0x38] sm:$0xff] }
  0x18   :  { %117 = vmatpush.xpose.msra.mxu0 %v109_v4  ;;  %140 = vmatpush.xpose.msra.mxu1 %v110_v5  ;;  %v87_v26 = vld [vmem:[#allocation6 + $0x20] sm:$0xff]  ;;  %v88_v27 = vld [vmem:[#allocation6 + $0x28] sm:$0xff]  ;;  %v85_v28 = vld [vmem:[#allocation6 + $0x10] sm:$0xff] }
  0x19   :  { %262 = vmatpush.xpose.msra.mxu2 %v109_v4  ;;  %278 = vmatpush.xpose.msra.mxu3 %v110_v5  ;;  %v86_v29 = vld [vmem:[#allocation6 + $0x18] sm:$0xff]  ;;  %v83_v30 = vld [vmem:[#allocation6] sm:$0xff]  ;;  %v84_v31 = vld [vmem:[#allocation6 + $0x8] sm:$0xff] }
  0x1a   :  { %v79_v32 = vld [vmem:[#allocation3] sm:$0xff]  ;;  %v80_v33 = vld [vmem:[#allocation3 + $0x8] sm:$0xff]  ;;  %v81_v34 = vld [vmem:[#allocation3 + $0x10] sm:$0xff] }
  0x1b   :  { %v82_v35 = vld [vmem:[#allocation3 + $0x18] sm:$0xff]  ;;  %v300_v36 = vld [vmem:[%s481_s2] ss:$0 sm:$0xff]  ;;  %v179_v47 = vld [vmem:[#allocation8 + $0x8] sm:$0xff] }
  0x1c   :  { %118 = vmatpush.xpose.msra.mxu0 %v107_v6  ;;  %141 = vmatpush.xpose.msra.mxu1 %v108_v7  ;;  %v178_v40 = vld [vmem:[#allocation8] sm:$0xff] }
  0x1d   :  { %263 = vmatpush.xpose.msra.mxu2 %v107_v6  ;;  %279 = vmatpush.xpose.msra.mxu3 %v108_v7 }
  0x20   :  { %119 = vmatpush.xpose.msra.mxu0 %v105_v8  ;;  %142 = vmatpush.xpose.msra.mxu1 %v106_v9 }
  0x21   :  { %264 = vmatpush.xpose.msra.mxu2 %v105_v8  ;;  %280 = vmatpush.xpose.msra.mxu3 %v106_v9 }
  0x24   :  { %120 = vmatpush.xpose.msra.mxu0 %v103_v10  ;;  %143 = vmatpush.xpose.msra.mxu1 %v104_v11 }
  0x25   :  { %265 = vmatpush.xpose.msra.mxu2 %v103_v10  ;;  %281 = vmatpush.xpose.msra.mxu3 %v104_v11 }
  0x28   :  { %121 = vmatpush.xpose.msra.mxu0 %v101_v12  ;;  %144 = vmatpush.xpose.msra.mxu1 %v102_v13 }
  0x29   :  { %266 = vmatpush.xpose.msra.mxu2 %v101_v12  ;;  %282 = vmatpush.xpose.msra.mxu3 %v102_v13  ;;  %v301_v12 = vld [vmem:[%s483_s4] ss:$0 sm:$0xff]  ;;  %s416_s4 = smov [#allocation9]  }
  0x2a   :  { %s244_s18 = sshll.u32 %s416_s4, 4  ;;  %s245_s18 = int_to_ptr.vmem [resolvable:$true] %s244_s18 }
  0x2c   :  { %122 = vmatpush.xpose.msra.mxu0 %v99_v14  ;;  %145 = vmatpush.xpose.msra.mxu1 %v100_v15 }
  0x2d   :  { %267 = vmatpush.xpose.msra.mxu2 %v99_v14  ;;  %283 = vmatpush.xpose.msra.mxu3 %v100_v15 }
  0x30   :  { %123 = vmatpush.xpose.msra.mxu0 %v97_v16  ;;  %146 = vmatpush.xpose.msra.mxu1 %v98_v17 }
  0x31   :  { %268 = vmatpush.xpose.msra.mxu2 %v97_v16  ;;  %284 = vmatpush.xpose.msra.mxu3 %v98_v17  ;;  %v302_v16 = vld [vmem:[%s484_s5] ss:$0 sm:$0xff] }
  0x34   :  { %124 = vmatpush.xpose.msra.mxu0 %v95_v18  ;;  %147 = vmatpush.xpose.msra.mxu1 %v96_v19 }
  0x35   :  { %269 = vmatpush.xpose.msra.mxu2 %v95_v18  ;;  %285 = vmatpush.xpose.msra.mxu3 %v96_v19 }
  0x38   :  { %125 = vmatpush.xpose.msra.mxu0 %v93_v20  ;;  %148 = vmatpush.xpose.msra.mxu1 %v94_v21 }
  0x39   :  { %270 = vmatpush.xpose.msra.mxu2 %v93_v20  ;;  %286 = vmatpush.xpose.msra.mxu3 %v94_v21 }
  0x3c   :  { %126 = vmatpush.xpose.msra.mxu0 %v91_v22  ;;  %149 = vmatpush.xpose.msra.mxu1 %v92_v23 }
  0x3d   :  { %271 = vmatpush.xpose.msra.mxu2 %v91_v22  ;;  %287 = vmatpush.xpose.msra.mxu3 %v92_v23 }
  0x40   :  { %127 = vmatpush.xpose.msra.mxu0 %v89_v24  ;;  %150 = vmatpush.xpose.msra.mxu1 %v90_v25 }
  0x41   :  { %272 = vmatpush.xpose.msra.mxu2 %v89_v24  ;;  %288 = vmatpush.xpose.msra.mxu3 %v90_v25 }
  0x44   :  { %128 = vmatpush.xpose.msra.mxu0 %v87_v26  ;;  %151 = vmatpush.xpose.msra.mxu1 %v88_v27 }
  0x45   :  { %273 = vmatpush.xpose.msra.mxu2 %v87_v26  ;;  %289 = vmatpush.xpose.msra.mxu3 %v88_v27 }
  0x48   :  { %129 = vmatpush.xpose.msra.mxu0 %v85_v28  ;;  %152 = vmatpush.xpose.msra.mxu1 %v86_v29 }
  0x49   :  { %274 = vmatpush.xpose.msra.mxu2 %v85_v28  ;;  %290 = vmatpush.xpose.msra.mxu3 %v86_v29 }
  0x4c   :  { %130 = vmatpush.xpose.msra.mxu0 %v83_v30  ;;  %153 = vmatpush.xpose.msra.mxu1 %v84_v31 }
  0x4d   :  { %275 = vmatpush.xpose.msra.mxu2 %v83_v30  ;;  %291 = vmatpush.xpose.msra.mxu3 %v84_v31 }
  0x4f   :  { %131 = vmatmul.f32.vlgmr.msra.gmra.mxu0 %v79_v32  ;;  %154 = vmatmul.f32.vlgmr.msra.gmra.mxu1 %v80_v33 }
  0x50   :  { %134 = vmatmul.f32.vlgmr.msra.gmra.mxu2 %v81_v34  ;;  %157 = vmatmul.f32.vlgmr.msra.gmra.mxu3 %v82_v35 }
  0xcc   :  { %v132_v37 = vpop.f32.mrf.mxu0  ;;  %v155_v38 = vpop.f32.mrf.mxu1 }
  0xcd   :  { %v156_v39 = vadd.f32 %v155_v38, %v132_v37 }
  0xcf   :  { %v176_v41 = vadd.f32 %v300_v36, %v156_v39 }
  0xd1   :  { %v180_v42 = vadd.f32 %v178_v40, %v176_v41 }
  0xd3   :  { %182 = vadd.xlane.f32.xlu0 %v180_v42  ;;  %v135_v43 = vpop.f32.mrf.mxu2  ;;  %v158_v44 = vpop.f32.mrf.mxu3  ;;  %v186_v45 = vmul.f32 %v180_v42, %v180_v42 }
  0xd4   :  { %v159_v46 = vadd.f32 %v158_v44, %v135_v43 }
  0xd5   :  { %188 = vadd.xlane.f32.xlu1 %v186_v45 }
  0xd6   :  { %v177_v48 = vadd.f32 %v300_v36, %v159_v46 }
  0xd8   :  { %v181_v49 = vadd.f32 %v179_v47, %v177_v48 }
  0xda   :  { %v187_v50 = vmul.f32 %v181_v49, %v181_v49 }
  0xdb   :  { %184 = vadd.xlane.f32.xlu0 %v181_v49 }
  0xdd   :  { %190 = vadd.xlane.f32.xlu1 %v187_v50 }
 0x146   :  { %v183_v51 = vpop.xlane.xlu0 %182 }
 0x147   :  { %v192_v52 = vmul.f32 0.0078125, %v183_v51 }
 0x148   :  { %v189_v53 = vpop.xlane.xlu1 %188 }
 0x149   :  { %v196_v54 = vmul.f32 %v192_v52, %v192_v52  ;;  %v194_v55 = vmul.f32 0.0078125, %v189_v53  ;;  %v202_v10 = vsub.f32 %v180_v42, %v192_v52 }
 0x14b   :  { %v198_v56 = vsub.f32 %v194_v55, %v196_v54 }
 0x14d   :  { %v200_v57 = vmax.f32 %v198_v56, 0.0 }
 0x14e   :  { %v185_v58 = vpop.xlane.xlu0 %184 }
 0x14f   :  { %v204_v59 = vadd.f32 1e-05, %v200_v57  ;;  %v193_v60 = vmul.f32 0.0078125, %v185_v58 }
 0x150   :  { %v191_v61 = vpop.xlane.xlu1 %190 }
 0x151   :  { %303 = vrsqrt.f32 %v204_v59  ;;  %v197_v62 = vmul.f32 %v193_v60, %v193_v60  ;;  %v195_v63 = vmul.f32 0.0078125, %v191_v61  ;;  %vm212_vm1 = vweird.f32 %v204_v59 }
 0x152   :  { %v203_v22 = vsub.f32 %v181_v49, %v193_v60 }
 0x153   :  { %v199_v0 = vsub.f32 %v195_v63, %v197_v62 }
 0x155   :  { %v201_v1 = vmax.f32 %v199_v0, 0.0 }
 0x157   :  { %v304_v2 = vpop.eup %303  ;;  %v205_v4 = vadd.f32 1e-05, %v201_v1 }
 0x158   :  { %v207_v3 = vmul.f32 %v304_v2, %v204_v59  ;;  %vm213_vm0 = vweird.f32 %v304_v2 }
 0x159   :  { %305 = vrsqrt.f32 %v205_v4  ;;  %vm214_vm2 = vmor %vm212_vm1, %vm213_vm0  ;;  %vm222_vm4 = vweird.f32 %v205_v4 }
 0x15a   :  { %v208_v5 = vmul.f32 %v304_v2, %v207_v3 }
 0x15c   :  { %v209_v6 = vmul.f32 0.5, %v208_v5 }
 0x15e   :  { %v210_v7 = vsub.f32 1.5, %v209_v6 }
 0x15f   :  { %v306_v8 = vpop.eup %305 }
 0x160   :  { %v211_v9 = vmul.f32 %v304_v2, %v210_v7  ;;  %v217_v11 = vmul.f32 %v306_v8, %v205_v4  ;;  %vm223_vm3 = vweird.f32 %v306_v8 }
 0x161   :  { %vm224_vm5 = vmor %vm222_vm4, %vm223_vm3 }
 0x162   :  { %v215_v13 = vsel %vm214_vm2, %v304_v2, %v211_v9  ;;  %v218_v14 = vmul.f32 %v306_v8, %v217_v11 }
 0x163   :  { %v226_v15 = vmul.f32 %v215_v13, %v202_v10 }
 0x164   :  { %v219_v17 = vmul.f32 0.5, %v218_v14 }
 0x165   :  { %v231_v18 = vmul.f32 %v301_v12, %v226_v15 }
 0x166   :  { %v220_v19 = vsub.f32 1.5, %v219_v17 }
 0x167   :  { %v236_v20 = vadd.f32 %v302_v16, %v231_v18 }
 0x168   :  { %v221_v21 = vmul.f32 %v306_v8, %v220_v19 }
 0x169   :  { %238 = vst [vmem:[#allocation9] sm:$0xff] %v236_v20 }
 0x16a   :  { %v225_v23 = vsel %vm224_vm5, %v306_v8, %v221_v21 }
 0x16b   :  { %v227_v24 = vmul.f32 %v225_v23, %v203_v22 }
 0x16d   :  { %v232_v25 = vmul.f32 %v301_v12, %v227_v24 }
 0x16f   :  { %v237_v26 = vadd.f32 %v302_v16, %v232_v25 }
 0x171   :  { %239 = vst [vmem:[#allocation9 + $0x8] sm:$0xff] %v237_v26 }
 0x172   :  { %252 = dma.vmem_to_hbm [thread:$0]  %s245_s18, 256, %s247_s21, [#allocation5], %s414_s13, %s414_s13, %s415_s14  }
 0x173   :  { %407 = dma.done.wait [#allocation5], 256  }
 0x174   :  { %408 = vsyncadd [#allocation5], 4294967040 }
 0x175   :  { %257 = vsyncpa [#allocation4], 1 }
 0x176   :  { %258 = vsyncpa [#allocation7], 1 }
 0x177   :  { %259 = vsyncpa [#allocation5], 1 }

</bundles_post_ra>
